<compile_context>
chip_gen: v7x
topology: tpu7x:2x2x1
jax: 0.10.0
libtpu: 0.0.40
codegen_flags: <defaults>
</compile_context>

<pallas_src>
import functools

import jax
import jax.numpy as jnp
from jax.experimental import pallas as pl
from jax.experimental.pallas import tpu as pltpu

CPAD = 8  # channels padded to one sublane tile per tap block (K = 9 * 8 = 72)


def _conv3x3_tanh_kernel(x_ref, w_ref, o_ref, im2col_ref, *, H, W, Cin):
    # x_ref:      (1, Cin, H*W)   one batch element; flattened spatial on lanes.
    # w_ref:      (Cout, 9*CPAD)  3x3 taps folded into the contraction dim (ky, kx, c).
    # o_ref:      (1, Cout, H*W)
    # im2col_ref: (9*CPAD, H*W)   VMEM staging buffer for the im2col matrix.
    hw = H * W

    # Pad channels Cin -> CPAD in-register (zero rows).  A (6, HW) and an (8, HW)
    # f32 tile occupy the same vregs, so this costs ~nothing and keeps every tap
    # block a full, aligned sublane tile (unmasked 8-row stores below).
    x = x_ref[0]                                               # (Cin, HW)
    x = jnp.concatenate(
        [x, jnp.zeros((CPAD - Cin, hw), x.dtype)], axis=0)     # (CPAD, HW)

    # Boundary masks, computed once; lane/row/col are dead after this block.
    lane = jax.lax.broadcasted_iota(jnp.int32, (CPAD, hw), 1)
    if W & (W - 1) == 0:                                       # power-of-two fast path
        row = lane >> (W.bit_length() - 1)
        col = lane & (W - 1)
    else:
        row = lane // W
        col = lane - row * W
    row_ok = {-1: row >= 1, 1: row < (H - 1)}                  # valid for dy = -1 / +1
    col_ok = {-1: col >= 1, 1: col < (W - 1)}                  # valid for dx = -1 / +1

    # Build the im2col matrix tap-by-tap straight into VMEM scratch.
    # shifted[p] = x[p + dy*W + dx] with zero-padding semantics at the borders.
    # Factored masking is exact: wherever the column mask keeps a value, the dx
    # shift stays within the row, so the row mask applied before the dx roll is
    # identical to the per-tap row mask.
    for ky in range(3):
        dy = ky - 1
        if dy == 0:
            x_dy = x
        else:
            x_dy = pltpu.roll(x, (-dy * W) % hw, 1)            # XLU lane rotate
            x_dy = jnp.where(row_ok[dy], x_dy, 0.0)            # row mask once per dy
        for kx in range(3):
            dx = kx - 1
            if dx == 0:
                tap = x_dy
            else:
                tap = pltpu.roll(x_dy, (-dx) % hw, 1)
                tap = jnp.where(col_ok[dx], tap, 0.0)          # col mask only
            # Full aligned 8-row store; padded rows carry zeros from x's pad rows.
            im2col_ref[pl.ds((ky * 3 + kx) * CPAD, CPAD), :] = tap

    # Single fused MXU matmul over the whole 3x3 window: (Cout, 72) @ (72, HW).
    acc = jnp.dot(w_ref[...], im2col_ref[...],
                  preferred_element_type=jnp.float32)          # (Cout, HW)
    o_ref[0, :, :] = jnp.tanh(acc).astype(o_ref.dtype)         # lane-dense store


def prepare_weight(w_oihw):
    """(Cout, Cin, 3, 3) -> (Cout, 9*CPAD), matching the kernel's im2col row order.

    Done ONCE at init (hoisted out of the per-call path); padded-channel columns
    are zero.  Column index = (ky*3 + kx)*CPAD + ci.
    """
    Cout, Cin, KH, KW = w_oihw.shape
    w_t = jnp.transpose(w_oihw, (0, 2, 3, 1))                       # (Cout, ky, kx, Cin)
    w_t = jnp.pad(w_t, ((0, 0), (0, 0), (0, 0), (0, CPAD - Cin)))
    return w_t.reshape(Cout, KH * KW * CPAD).astype(jnp.float32)


@jax.jit
def conv3x3_tanh(x_nchw, w_flat):
    """x: (N, Cin, H, W) f32, w_flat: (Cout, 9*CPAD) f32 -> (N, Cout, H, W) f32."""
    N, Cin, H, W = x_nchw.shape
    Cout, K = w_flat.shape
    HW = H * W

    # NCHW -> (N, Cin, H*W) is a free contiguous reshape; no pad pass on x.
    x_flat = x_nchw.reshape(N, Cin, HW)

    kernel = functools.partial(_conv3x3_tanh_kernel, H=H, W=W, Cin=Cin)
    out_flat = pl.pallas_call(
        kernel,
        out_shape=jax.ShapeDtypeStruct((N, Cout, HW), jnp.float32),
        grid_spec=pltpu.PrefetchScalarGridSpec(
            num_scalar_prefetch=0,
            grid=(N,),
            in_specs=[
                # Full-array block on the last two dims (6 == array dim is allowed).
                pl.BlockSpec((1, Cin, HW), lambda n: (n, 0, 0)),
                pl.BlockSpec((Cout, K), lambda n: (0, 0)),
            ],
            out_specs=pl.BlockSpec((1, Cout, HW), lambda n: (n, 0, 0)),
            scratch_shapes=[pltpu.VMEM((K, HW), jnp.float32)],   # im2col staging
        ),
        compiler_params=pltpu.CompilerParams(
            dimension_semantics=("parallel",),   # batches shard across TCs (v7x)
        ),
    )(x_flat, w_flat)

    # (N, Cout, H*W) -> NCHW is a free reshape (no transpose needed).
    return out_flat.reshape(N, Cout, H, W)


if __name__ == "__main__":
    key = jax.random.PRNGKey(0)
    kx, kw = jax.random.split(key)

    # Shapes implied by the module: input (1, 6, 32, 32), weight (16, 6, 3, 3).
    x = jax.random.normal(kx, (1, 6, 32, 32), dtype=jnp.float32)
    fan_in = 6 * 3 * 3
    bound = (1.0 / fan_in) ** 0.5
    w = jax.random.uniform(kw, (16, 6, 3, 3), dtype=jnp.float32,
                           minval=-bound, maxval=bound)

    # Weight prep hoisted out of the per-call path: computed once at init.
    w_flat = jax.block_until_ready(prepare_weight(w))

    out = conv3x3_tanh(x, w_flat)
    jax.block_until_ready(out)

    # Reference: XLA conv with the same semantics as torch Conv2d (NCHW/OIHW) + tanh.
    ref = jnp.tanh(jax.lax.conv_general_dilated(
        x, w, window_strides=(1, 1), padding=((1, 1), (1, 1)),
        dimension_numbers=("NCHW", "OIHW", "NCHW")))
    assert out.shape == (1, 16, 32, 32)
    assert jnp.allclose(out, ref, atol=1e-4, rtol=1e-4), (
        float(jnp.max(jnp.abs(out - ref))))

    print("KERNEL_OK")
</pallas_src>

<mosaic_0001>
module attributes {stable_mosaic.version = 11 : i64} {
  func.func @_conv3x3_tanh_kernel(%arg0: i32, %arg1: memref<1x6x1024xf32, #tpu.memory_space<vmem>>, %arg2: memref<16x72xf32, #tpu.memory_space<vmem>>, %arg3: memref<1x16x1024xf32, #tpu.memory_space<vmem>>, %arg4: memref<72x1024xf32, #tpu.memory_space<vmem>>) attributes {dimension_semantics = [#tpu.dimension_semantics<parallel>], iteration_bounds = array<i64: 1>, scalar_prefetch = 0 : i64, scratch_operands = 1 : i64, tpu.core_type = #tpu.core_type<tc>, window_params = [{transform_indices = @transform_0, window_bounds = array<i64: 1, 6, 1024>}, {pipeline_mode = #tpu.pipeline_mode<synchronous>, transform_indices = @transform_1, window_bounds = array<i64: 16, 72>}, {transform_indices = @transform_2, window_bounds = array<i64: 1, 16, 1024>}]} {
    %c0 = arith.constant 0 : index
    %c0_0 = arith.constant 0 : index
    %c0_1 = arith.constant 0 : index
    %0 = vector.load %arg1[%c0, %c0_0, %c0_1] : memref<1x6x1024xf32, #tpu.memory_space<vmem>>, vector<1x6x1024xf32>
    %1 = vector.shape_cast %0 : vector<1x6x1024xf32> to vector<6x1024xf32>
    %cst = arith.constant 0.000000e+00 : f32
    %2 = vector.broadcast %cst : f32 to vector<2x1024xf32>
    %3 = tpu.concatenate %1, %2 in 0 : vector<6x1024xf32>, vector<2x1024xf32> -> vector<8x1024xf32>
    %4 = tpu.iota {dimensions = array<i32: 1>} : vector<8x1024xi32>
    %c5_i32 = arith.constant 5 : i32
    %5 = vector.broadcast %c5_i32 : i32 to vector<8x1024xi32>
    %6 = arith.shrsi %4, %5 : vector<8x1024xi32>
    %c31_i32 = arith.constant 31 : i32
    %7 = vector.broadcast %c31_i32 : i32 to vector<8x1024xi32>
    %8 = arith.andi %4, %7 : vector<8x1024xi32>
    %c1_i32 = arith.constant 1 : i32
    %9 = vector.broadcast %c1_i32 : i32 to vector<8x1024xi32>
    %10 = arith.cmpi sge, %6, %9 : vector<8x1024xi32>
    %c31_i32_2 = arith.constant 31 : i32
    %11 = vector.broadcast %c31_i32_2 : i32 to vector<8x1024xi32>
    %12 = arith.cmpi slt, %6, %11 : vector<8x1024xi32>
    %c1_i32_3 = arith.constant 1 : i32
    %13 = vector.broadcast %c1_i32_3 : i32 to vector<8x1024xi32>
    %14 = arith.cmpi sge, %8, %13 : vector<8x1024xi32>
    %c31_i32_4 = arith.constant 31 : i32
    %15 = vector.broadcast %c31_i32_4 : i32 to vector<8x1024xi32>
    %16 = arith.cmpi slt, %8, %15 : vector<8x1024xi32>
    %c32_i32 = arith.constant 32 : i32
    %17 = tpu.dynamic_rotate %3 by %c32_i32 dim 1 : vector<8x1024xf32>, i32 -> vector<8x1024xf32>
    %cst_5 = arith.constant 0.000000e+00 : f32
    %18 = vector.broadcast %cst_5 : f32 to vector<8x1024xf32>
    %19 = arith.select %10, %17, %18 : vector<8x1024xi1>, vector<8x1024xf32>
    %c1_i32_6 = arith.constant 1 : i32
    %20 = tpu.dynamic_rotate %19 by %c1_i32_6 dim 1 : vector<8x1024xf32>, i32 -> vector<8x1024xf32>
    %cst_7 = arith.constant 0.000000e+00 : f32
    %21 = vector.broadcast %cst_7 : f32 to vector<8x1024xf32>
    %22 = arith.select %14, %20, %21 : vector<8x1024xi1>, vector<8x1024xf32>
    %c0_8 = arith.constant 0 : index
    %c0_9 = arith.constant 0 : index
    %23 = vector.load %arg4[%c0_8, %c0_9] : memref<72x1024xf32, #tpu.memory_space<vmem>>, vector<8x1024xf32>
    tpu.vector_store %arg4[%c0_8, %c0_9], %22 {strides = array<i32>} : memref<72x1024xf32, #tpu.memory_space<vmem>>, vector<8x1024xf32>,
    %c8 = arith.constant 8 : index
    %c0_10 = arith.constant 0 : index
    %24 = vector.load %arg4[%c8, %c0_10] : memref<72x1024xf32, #tpu.memory_space<vmem>>, vector<8x1024xf32>
    tpu.vector_store %arg4[%c8, %c0_10], %19 {strides = array<i32>} : memref<72x1024xf32, #tpu.memory_space<vmem>>, vector<8x1024xf32>,
    %c1023_i32 = arith.constant 1023 : i32
    %25 = tpu.dynamic_rotate %19 by %c1023_i32 dim 1 : vector<8x1024xf32>, i32 -> vector<8x1024xf32>
    %cst_11 = arith.constant 0.000000e+00 : f32
    %26 = vector.broadcast %cst_11 : f32 to vector<8x1024xf32>
    %27 = arith.select %16, %25, %26 : vector<8x1024xi1>, vector<8x1024xf32>
    %c16 = arith.constant 16 : index
    %c0_12 = arith.constant 0 : index
    %28 = vector.load %arg4[%c16, %c0_12] : memref<72x1024xf32, #tpu.memory_space<vmem>>, vector<8x1024xf32>
    tpu.vector_store %arg4[%c16, %c0_12], %27 {strides = array<i32>} : memref<72x1024xf32, #tpu.memory_space<vmem>>, vector<8x1024xf32>,
    %c1_i32_13 = arith.constant 1 : i32
    %29 = tpu.dynamic_rotate %3 by %c1_i32_13 dim 1 : vector<8x1024xf32>, i32 -> vector<8x1024xf32>
    %cst_14 = arith.constant 0.000000e+00 : f32
    %30 = vector.broadcast %cst_14 : f32 to vector<8x1024xf32>
    %31 = arith.select %14, %29, %30 : vector<8x1024xi1>, vector<8x1024xf32>
    %c24 = arith.constant 24 : index
    %c0_15 = arith.constant 0 : index
    %32 = vector.load %arg4[%c24, %c0_15] : memref<72x1024xf32, #tpu.memory_space<vmem>>, vector<8x1024xf32>
    tpu.vector_store %arg4[%c24, %c0_15], %31 {strides = array<i32>} : memref<72x1024xf32, #tpu.memory_space<vmem>>, vector<8x1024xf32>,
    %c32 = arith.constant 32 : index
    %c0_16 = arith.constant 0 : index
    %33 = vector.load %arg4[%c32, %c0_16] : memref<72x1024xf32, #tpu.memory_space<vmem>>, vector<8x1024xf32>
    tpu.vector_store %arg4[%c32, %c0_16], %3 {strides = array<i32>} : memref<72x1024xf32, #tpu.memory_space<vmem>>, vector<8x1024xf32>,
    %c1023_i32_17 = arith.constant 1023 : i32
    %34 = tpu.dynamic_rotate %3 by %c1023_i32_17 dim 1 : vector<8x1024xf32>, i32 -> vector<8x1024xf32>
    %cst_18 = arith.constant 0.000000e+00 : f32
    %35 = vector.broadcast %cst_18 : f32 to vector<8x1024xf32>
    %36 = arith.select %16, %34, %35 : vector<8x1024xi1>, vector<8x1024xf32>
    %c40 = arith.constant 40 : index
    %c0_19 = arith.constant 0 : index
    %37 = vector.load %arg4[%c40, %c0_19] : memref<72x1024xf32, #tpu.memory_space<vmem>>, vector<8x1024xf32>
    tpu.vector_store %arg4[%c40, %c0_19], %36 {strides = array<i32>} : memref<72x1024xf32, #tpu.memory_space<vmem>>, vector<8x1024xf32>,
    %c992_i32 = arith.constant 992 : i32
    %38 = tpu.dynamic_rotate %3 by %c992_i32 dim 1 : vector<8x1024xf32>, i32 -> vector<8x1024xf32>
    %cst_20 = arith.constant 0.000000e+00 : f32
    %39 = vector.broadcast %cst_20 : f32 to vector<8x1024xf32>
    %40 = arith.select %12, %38, %39 : vector<8x1024xi1>, vector<8x1024xf32>
    %c1_i32_21 = arith.constant 1 : i32
    %41 = tpu.dynamic_rotate %40 by %c1_i32_21 dim 1 : vector<8x1024xf32>, i32 -> vector<8x1024xf32>
    %cst_22 = arith.constant 0.000000e+00 : f32
    %42 = vector.broadcast %cst_22 : f32 to vector<8x1024xf32>
    %43 = arith.select %14, %41, %42 : vector<8x1024xi1>, vector<8x1024xf32>
    %c48 = arith.constant 48 : index
    %c0_23 = arith.constant 0 : index
    %44 = vector.load %arg4[%c48, %c0_23] : memref<72x1024xf32, #tpu.memory_space<vmem>>, vector<8x1024xf32>
    tpu.vector_store %arg4[%c48, %c0_23], %43 {strides = array<i32>} : memref<72x1024xf32, #tpu.memory_space<vmem>>, vector<8x1024xf32>,
    %c56 = arith.constant 56 : index
    %c0_24 = arith.constant 0 : index
    %45 = vector.load %arg4[%c56, %c0_24] : memref<72x1024xf32, #tpu.memory_space<vmem>>, vector<8x1024xf32>
    tpu.vector_store %arg4[%c56, %c0_24], %40 {strides = array<i32>} : memref<72x1024xf32, #tpu.memory_space<vmem>>, vector<8x1024xf32>,
    %c1023_i32_25 = arith.constant 1023 : i32
    %46 = tpu.dynamic_rotate %40 by %c1023_i32_25 dim 1 : vector<8x1024xf32>, i32 -> vector<8x1024xf32>
    %cst_26 = arith.constant 0.000000e+00 : f32
    %47 = vector.broadcast %cst_26 : f32 to vector<8x1024xf32>
    %48 = arith.select %16, %46, %47 : vector<8x1024xi1>, vector<8x1024xf32>
    %c64 = arith.constant 64 : index
    %c0_27 = arith.constant 0 : index
    %49 = vector.load %arg4[%c64, %c0_27] : memref<72x1024xf32, #tpu.memory_space<vmem>>, vector<8x1024xf32>
    tpu.vector_store %arg4[%c64, %c0_27], %48 {strides = array<i32>} : memref<72x1024xf32, #tpu.memory_space<vmem>>, vector<8x1024xf32>,
    %c0_28 = arith.constant 0 : index
    %c0_29 = arith.constant 0 : index
    %50 = vector.load %arg2[%c0_28, %c0_29] : memref<16x72xf32, #tpu.memory_space<vmem>>, vector<16x72xf32>
    %c0_30 = arith.constant 0 : index
    %c0_31 = arith.constant 0 : index
    %51 = vector.load %arg4[%c0_30, %c0_31] : memref<72x1024xf32, #tpu.memory_space<vmem>>, vector<72x1024xf32>
    %cst_32 = arith.constant dense<0.000000e+00> : vector<16x1024xf32>
    %52 = tpu.matmul %50, %51, %cst_32 {dimension_numbers = #tpu.dot_dimension_numbers<[1], [0], [0], [1], [0, 0, 1, 1], [], []>} : vector<16x72xf32>, vector<72x1024xf32>, vector<16x1024xf32> -> vector<16x1024xf32>
    %53 = math.tanh %52 : vector<16x1024xf32>
    %c0_33 = arith.constant 0 : index
    %c0_34 = arith.constant 0 : index
    %c0_35 = arith.constant 0 : index
    %54 = vector.load %arg3[%c0_33, %c0_34, %c0_35] : memref<1x16x1024xf32, #tpu.memory_space<vmem>>, vector<1x16x1024xf32>
    %55 = vector.shape_cast %54 : vector<1x16x1024xf32> to vector<16x1024xf32>
    %56 = vector.shape_cast %53 : vector<16x1024xf32> to vector<1x16x1024xf32>
    tpu.vector_store %arg3[%c0_33, %c0_34, %c0_35], %56 {strides = array<i32>} : memref<1x16x1024xf32, #tpu.memory_space<vmem>>, vector<1x16x1024xf32>,
    return
  }
  func.func @transform_0(%arg0: i32) -> (i32, i32, i32) {
    %c0_i32 = arith.constant 0 : i32
    %c0_i32_0 = arith.constant 0 : i32
    %c0_i32_1 = arith.constant 0 : i32
    return %arg0, %c0_i32, %c0_i32_0 : i32, i32, i32
  }
  func.func @transform_1(%arg0: i32) -> (i32, i32) {
    %c0_i32 = arith.constant 0 : i32
    %c0_i32_0 = arith.constant 0 : i32
    %c0_i32_1 = arith.constant 0 : i32
    return %c0_i32, %c0_i32_0 : i32, i32
  }
  func.func @transform_2(%arg0: i32) -> (i32, i32, i32) {
    %c0_i32 = arith.constant 0 : i32
    %c0_i32_0 = arith.constant 0 : i32
    %c0_i32_1 = arith.constant 0 : i32
    return %arg0, %c0_i32, %c0_i32_0 : i32, i32, i32
  }
}

</mosaic_0001>

<bundles_post_ra>
// kernel: conv3x3_tanh.1
= control target key start
LH: loop header
LB: loop body
LE: loop exit
PB: predicated region body
PF: predicated region fallthrough
CT: control target
= control target key end

     0   :  { %vm2128_vm0 = vcmask 1045504   ;;  %s1170_s25 = smov 32   ;;  %s1171_s26 = smov 96   ;;  %v28_v23 = vlaneseq  ;;  %v2178_v47 = vmov 0  ;;  %v2184_v62 = vmov 0  ;;  %s2124_s0 = inlined_call_operand.vmem [shape: f32[1,6,1024], index: 0, kind: input, shape index: {}]   ;;  %s2125_s1 = inlined_call_operand.vmem [shape: f32[16,72], index: 1, kind: input, shape index: {}]   ;;  %s2126_s2 = inlined_call_operand.vmem [shape: f32[1,16,1024], index: 2, kind: output, shape index: {}]  }
   0x1   :  { %v1193_v0 = vld [vmem:[%s2124_s0 + $0x30] sm:$0x3f]  ;;  %v1198_v1 = vld [vmem:[%s2124_s0 + $0x38] sm:$0x3f]  ;;  %v1203_v2 = vld [vmem:[%s2124_s0] sm:$0x3f] }
   0x2   :  { %2170 = vst [vmem:[#allocation3_spill] sm:$0xff] %v1193_v0  ;;  %2171 = vst [vmem:[#allocation4_spill] sm:$0xff] %v1198_v1  ;;  %v1207_v3 = vsel %vm2128_vm0, %v1193_v0, 0.0  ;;  %v1211_v4 = vsel %vm2128_vm0, %v1198_v1, 0.0  ;;  %v1216_v5 = vld [vmem:[%s2124_s0 + $0x8] sm:$0x3f] }
   0x3   :  { %v1220_v6 = vsel %vm2128_vm0, %v1203_v2, 0.0  ;;  %v1033_v7 = vpack.i.bf16 %v1207_v3, %v1211_v4  ;;  %v1226_v8 = vsel %vm2128_vm0, %v1216_v5, 0.0  ;;  %v1231_v9 = vld [vmem:[%s2124_s0 + $0x20] sm:$0x3f]  ;;  %v1236_v10 = vld [vmem:[%s2124_s0 + $0x28] sm:$0x3f] }
   0x4   :  { %2172 = vst [vmem:[#allocation5_spill] sm:$0xff] %v1231_v9  ;;  %2173 = vst [vmem:[#allocation6_spill] sm:$0xff] %v1236_v10  ;;  %v1023_v11 = vpack.i.bf16 %v1226_v8, %v1220_v6  ;;  %v24_v12 = vsel %vm2128_vm0, %v1231_v9, 0.0  ;;  %v1244_v13 = vsel %vm2128_vm0, %v1236_v10, 0.0  ;;  %v1249_v14 = vld [vmem:[%s2124_s0 + $0x10] sm:$0x3f] }
   0x5   :  { %v1254_v15 = vld [vmem:[%s2124_s0 + $0x18] sm:$0x3f]  ;;  %1034 = vrot.lane.b32.xlu1 %v1033_v7, %s1170_s25  ;;  %v1038_v16 = vpack.i.bf16 %v1244_v13, %v24_v12  ;;  %v22_v17 = vsel %vm2128_vm0, %v1249_v14, 0.0  ;;  %s1172_s0 = smov 1   ;;  %v1058_v22 = vpack.i.bf16 %v1220_v6, %v24_v12  ;;  %s1173_s27 = smov 127   ;;  %v1274_v24 = vand.u32 127, %v28_v23 }
   0x6   :  { %v23_v18 = vsel %vm2128_vm0, %v1254_v15, 0.0  ;;  %1024 = vrot.lane.b32.xlu0 %v1023_v11, %s1170_s25  ;;  %v1043_v20 = vpack.i.bf16 %v22_v17, %v1226_v8 }
   0x7   :  { %v1028_v19 = vpack.i.bf16 %v23_v18, %v22_v17  ;;  %v1048_v21 = vpack.i.bf16 %v1211_v4, %v23_v18  ;;  %v1277_v25 = vadd.s32 128, %v1274_v24  ;;  %v1280_v26 = vadd.s32 896, %v1274_v24 }
   0x8   :  { %v1283_v27 = vadd.s32 256, %v1274_v24  ;;  %v1286_v28 = vadd.s32 384, %v1274_v24  ;;  %v37_v29 = vshra.s32 %v1274_v24, 5  ;;  %v1291_v31 = vadd.s32 512, %v1274_v24 }
   0x9   :  { %1039 = vrot.lane.b32.xlu1 %v1038_v16, %s1170_s25  ;;  %v38_v30 = vshra.s32 %v1277_v25, 5  ;;  %vm101_vm1 = vcmp.lt.s32.totalorder %v1274_v24, 32  ;;  %v44_v33 = vshra.s32 %v1280_v26, 5  ;;  %vm2130_vm8 = vcmp.lt.s32.totalorder %v1274_v24, 96 }
   0xa   :  { %1029 = vrot.lane.b32.xlu0 %v1028_v19, %s1170_s25  ;;  %v39_v37 = vshra.s32 %v1283_v27, 5  ;;  %v40_v38 = vshra.s32 %v1286_v28, 5  ;;  %vm1301_vm2 = vcmp.ge.s32.totalorder %v37_v29, 1  ;;  %v2127_v43 = vshra.s32 %v1291_v31, 5 }
   0xb   :  { %vm1305_vm3 = vcmp.ge.s32.totalorder %v38_v30, 1  ;;  %vm1320_vm4 = vcmp.ge.s32.totalorder %v44_v33, 1  ;;  %vm1386_vm9 = vcmp.lt.s32.totalorder %v38_v30, 31  ;;  %vm1393_vm10 = vcmp.lt.s32.totalorder %v37_v29, 31 }
   0xc   :  { %v2179_v47 = vsel %vm1320_vm4, 4294967295, %v2178_v47  ;;  %vm1336_vm5 = vcmp.ge.s32.totalorder %v39_v37, 1  ;;  %vm1340_vm6 = vcmp.ge.s32.totalorder %v40_v38, 1  ;;  %vm1361_vm7 = vcmp.ge.s32.totalorder %v2127_v43, 1 }
   0xd   :  { %298 = vrot.lane.b32.xlu1 %v1226_v8, %s1171_s26  ;;  %v2185_v62 = vsel %vm1361_vm7, 4294967295, %v2184_v62  ;;  %vm1412_vm11 = vcmp.lt.s32.totalorder %v44_v33, 31  ;;  %vm1416_vm12 = vcmp.lt.s32.totalorder %v40_v38, 31  ;;  %vm1424_vm13 = vcmp.lt.s32.totalorder %v39_v37, 31 }
   0xe   :  { %296 = vrot.lane.b32.xlu0 %v1220_v6, %s1171_s26 }
  0x11   :  { %302 = vrot.lane.b32.xlu1 %v23_v18, %s1171_s26 }
  0x12   :  { %300 = vrot.lane.b32.xlu0 %v22_v17, %s1171_s26 }
  0x15   :  { %310 = vrot.lane.b32.xlu1 %v1211_v4, %s1171_s26 }
  0x16   :  { %304 = vrot.lane.b32.xlu0 %v24_v12, %s1171_s26 }
  0x19   :  { %308 = vrot.lane.b32.xlu1 %v1207_v3, %s1171_s26 }
  0x1a   :  { %306 = vrot.lane.b32.xlu0 %v1244_v13, %s1171_s26 }
  0x1d   :  { %1044 = vrot.lane.b32.xlu1 %v1043_v20, %s1172_s0 }
  0x1e   :  { %1049 = vrot.lane.b32.xlu0 %v1048_v21, %s1172_s0  ;;  %v2186_v21 = vmov 0 }
  0x1f   :  { %v2187_v21 = vsel %vm1386_vm9, 4294967295, %v2186_v21 }
  0x21   :  { %1059 = vrot.lane.b32.xlu1 %v1058_v22, %s1173_s27  ;;  %v2189_v22 = vmov 0 }
  0x22   :  { %1054 = vrot.lane.b32.xlu0 %v1028_v19, %s1173_s27  ;;  %v1382_v19 = vadd.s32 640, %v1274_v24  ;;  %v2190_v22 = vsel %vm1393_vm10, 4294967295, %v2189_v22 }
  0x24   :  { %v42_v29 = vshra.s32 %v1382_v19, 5 }
  0x25   :  { %1064 = vrot.lane.b32.xlu1 %v1038_v16, %s1172_s0 }
  0x26   :  { %vm1447_vm14 = vcmp.ge.s32.totalorder %v42_v29, 1 }
  0x77   :  { %v1293_v32 = vpop.permute.xlu1 %1034 }
  0x78   :  { %v1037_v34 = vunpack.i.h.bf16 %v1293_v32  ;;  %v1036_v35 = vunpack.i.l.bf16 %v1293_v32  ;;  %v1025_v36 = vpop.permute.xlu0 %1024 }
  0x79   :  { %v1027_v39 = vunpack.i.h.bf16 %v1025_v36  ;;  %v1026_v40 = vunpack.i.l.bf16 %v1025_v36 }
  0x7a   :  { %v1328_v48 = vsel %vm101_vm1, %v1037_v34, %v1036_v35 }
  0x7b   :  { %v1310_v44 = vpop.permute.xlu1 %1039  ;;  %v1314_v45 = vsel %vm101_vm1, %v1026_v40, %v1027_v39  ;;  %v1318_v46 = vsel %vm101_vm1, %v1036_v35, %v1026_v40  ;;  %v1348_v58 = vsel %vm1320_vm4, %v1328_v48, 0.0  ;;  %vm2207_vm4 = vcmp.lt.s32.totalorder %v1274_v24, 96 }
  0x7c   :  { %v1030_v49 = vpop.permute.xlu0 %1029  ;;  %v110_v50 = vsel %vm1301_vm2, %v1318_v46, 0.0  ;;  %v111_v51 = vsel %vm1305_vm3, %v1314_v45, 0.0  ;;  %v1041_v54 = vunpack.i.l.bf16 %v1310_v44  ;;  %v1078_v17 = vpack.i.bf16 %v1220_v6, %v1348_v58 }
  0x7d   :  { %v1032_v55 = vunpack.i.h.bf16 %v1030_v49  ;;  %v1031_v56 = vunpack.i.l.bf16 %v1030_v49  ;;  %v1068_v57 = vpack.i.bf16 %v111_v51, %v110_v50  ;;  %v1391_v6 = vadd.s32 768, %v1274_v24 }
  0x7e   :  { %v1042_v49 = vunpack.i.h.bf16 %v1310_v44  ;;  %v2196_v44 = vmov 0 }
  0x7f   :  { %1069 = vrot.lane.b32.xlu0 %v1068_v57, %s1172_s0  ;;  %v299_v59 = vpop.permute.xlu1 %298  ;;  %v1353_v60 = vsel %vm101_vm1, %v1031_v56, %v1032_v55  ;;  %v1357_v61 = vsel %vm101_vm1, %v1027_v39, %v1031_v56  ;;  %v1367_v63 = vsel %vm101_vm1, %v1032_v55, %v1041_v54  ;;  %2188 = vst [vmem:[#allocation7_spill] sm:$0xff] %v1391_v6  ;;  %v2191_v55 = vmov 0 }
  0x80   :  { %v297_v7 = vpop.permute.xlu0 %296  ;;  %v112_v11 = vsel %vm1336_vm5, %v1357_v61, 0.0  ;;  %v113_v12 = vsel %vm1340_vm6, %v1353_v60, 0.0  ;;  %v114_v18 = vsel %vm1361_vm7, %v1367_v63, 0.0  ;;  %v2192_v55 = vsel %vm1412_vm11, 4294967295, %v2191_v55 }
  0x81   :  { %v1073_v16 = vpack.i.bf16 %v113_v12, %v112_v11  ;;  %v1399_v35 = vsel %vm2130_vm8, %v297_v7, %v299_v59  ;;  %v1083_v30 = vpack.i.bf16 %v112_v11, %v111_v51  ;;  %v1088_v39 = vpack.i.bf16 %v114_v18, %v113_v12  ;;  %2193 = vst [vmem:[#allocation8_spill] sm:$0xff] %v2192_v55 }
  0x82   :  { %v2194_v51 = vmov 0  ;;  %v43_v57 = vshra.s32 %v1391_v6, 5  ;;  %v2197_v44 = vsel %vm1424_vm13, 4294967295, %v2196_v44  ;;  %v2143_v43 = vand.u32 31, %v1391_v6 }
  0x83   :  { %1074 = vrot.lane.b32.xlu1 %v1073_v16, %s1172_s0  ;;  %1079 = vrot.lane.b32.xlu0 %v1078_v17, %s1172_s0  ;;  %v303_v20 = vpop.permute.xlu1 %302  ;;  %v2195_v51 = vsel %vm1416_vm12, 4294967295, %v2194_v51  ;;  %v1093_v17 = vpack.i.bf16 %v1226_v8, %v110_v50  ;;  %v1461_v8 = vsel %vm101_vm1, %v1042_v49, %v1037_v34  ;;  %v1465_v50 = vsel %vm101_vm1, %v1041_v54, %v1042_v49 }
  0x84   :  { %v301_v23 = vpop.permute.xlu0 %300  ;;  %vm1453_vm15 = vcmp.ge.s32.totalorder %v43_v57, 1  ;;  %v115_v32 = vsel %vm1447_vm14, %v1465_v50, 0.0  ;;  %v2203_v54 = vmov 0  ;;  %vm1490_vm0 = vcmp.ge.s32.totalorder %v2143_v43, 1 }
  0x85   :  { %v1403_v36 = vsel %vm2130_vm8, %v299_v59, %v301_v23  ;;  %v321_v59 = vsel %vm1393_vm10, %v1399_v35, 0.0  ;;  %v1434_v38 = vsel %vm2130_vm8, %v301_v23, %v303_v20  ;;  %v2144_v23 = vand.u32 31, %v1291_v31 }
  0x86   :  { %v322_v40 = vsel %vm1386_vm9, %v1403_v36, 0.0  ;;  %v116_v34 = vsel %vm1453_vm15, %v1461_v8, 0.0  ;;  %vm2240_vm9 = vcmp.lt.s32.totalorder %v1274_v24, 1 }
  0x87   :  { %1084 = vrot.lane.b32.xlu1 %v1083_v30, %s1173_s27  ;;  %1089 = vrot.lane.b32.xlu0 %v1088_v39, %s1173_s27  ;;  %v311_v56 = vpop.permute.xlu1 %310  ;;  %v1098_v12 = vpack.i.bf16 %v322_v40, %v321_v59  ;;  %v2199_v30 = vmov 0  ;;  %v323_v39 = vsel %vm1424_vm13, %v1434_v38, 0.0  ;;  %vm1482_vm1 = vcmp.ge.s32.totalorder %v2144_v23, 1 }
  0x88   :  { %v1430_v33 = vsel %vm2130_vm8, %v311_v56, %v297_v7  ;;  %v305_v11 = vpop.permute.xlu0 %304  ;;  %v2200_v30 = vsel %vm1447_vm14, 4294967295, %v2199_v30  ;;  %v2204_v54 = vsel %vm1482_vm1, 4294967295, %v2203_v54  ;;  %v1113_v49 = vpack.i.bf16 %v116_v34, %v115_v32 }
  0x89   :  { %2198 = vst [vmem:[#allocation9_spill] sm:$0xff] %v1430_v33  ;;  %v1438_v16 = vsel %vm2130_vm8, %v303_v20, %v305_v11  ;;  %v328_v37 = vsel %vm1412_vm11, %v1430_v33, 0.0  ;;  %v2201_v20 = vmov 0  ;;  %v2205_v33 = vmov 0 }
  0x8a   :  { %v324_v7 = vsel %vm1416_vm12, %v1438_v16, 0.0  ;;  %v2202_v20 = vsel %vm1453_vm15, 4294967295, %v2201_v20  ;;  %v2206_v33 = vsel %vm1490_vm0, 4294967295, %v2205_v33  ;;  %v2209_v32 = vshra.s32 %v1291_v31, 5 }
  0x8b   :  { %1094 = vrot.lane.b32.xlu1 %v1093_v17, %s1173_s27  ;;  %1099 = vrot.lane.b32.xlu0 %v1098_v12, %s1172_s0  ;;  %v1108_v12 = vpack.i.bf16 %v114_v18, %v328_v37  ;;  %v1103_v17 = vpack.i.bf16 %v324_v7, %v323_v39  ;;  %v2133_v18 = vmov 0.0   ;;  %v2210_v34 = vmov 0 }
  0x8c   :  { %562 = vmatprep.mubr.f32.mxu0 %v2133_v18  ;;  %639 = vmatprep.mubr.f32.mxu1 %v2133_v18  ;;  %vm1512_vm8 = vcmp.lt.s32.totalorder %v2209_v32, 31  ;;  %vm2216_vm11 = vcmp.lt.s32.totalorder %v1274_v24, 96  ;;  %v1128_v18 = vpack.i.bf16 %v1211_v4, %v1207_v3  ;;  %vm2248_vm12 = vcmp.lt.s32.totalorder %v1274_v24, 127 }
  0x8d   :  { %v2211_v34 = vsel %vm1512_vm8, 4294967295, %v2210_v34 }
  0x8e   :  { %2212 = vst [vmem:[#allocation11_spill] sm:$0xff] %v2211_v34 }
  0x8f   :  { %1104 = vrot.lane.b32.xlu1 %v1103_v17, %s1172_s0  ;;  %1109 = vrot.lane.b32.xlu0 %v1108_v12, %s1172_s0  ;;  %v307_v12 = vpop.permute.xlu0 %306 }
  0x90   :  { %v1506_v17 = vsel %vm2207_vm4, %v305_v11, %v307_v12  ;;  %v309_v11 = vpop.permute.xlu1 %308  ;;  %vm1523_vm4 = vcmp.lt.s32.totalorder %v42_v29, 31 }
  0x91   :  { %2208 = vst [vmem:[#allocation10_spill] sm:$0xff] %v1506_v17  ;;  %v1529_v32 = vsel %vm2216_vm11, %v307_v12, %v309_v11  ;;  %v45_v12 = vand.u32 31, %v1274_v24 }
  0x92   :  { %2217 = vst [vmem:[#allocation13_spill] sm:$0xff] %v1529_v32 }
  0x93   :  { %1114 = vrot.lane.b32.xlu1 %v1113_v49, %s1172_s0  ;;  %379 = vrot.lane.b32.xlu0 %v322_v40, %s1173_s27  ;;  %v325_v40 = vsel %vm1512_vm8, %v1506_v17, 0.0  ;;  %vm2218_vm8 = vmmov %vm2216_vm11  ;;  %vm1545_vm11 = vcmp.lt.s32.totalorder %v43_v57, 31  ;;  %vm1581_vm15 = vcmp.ge.s32.totalorder %v45_v12, 1  ;;  %vm1623_vm13 = vcmp.lt.s32.totalorder %v45_v12, 31 }
  0x97   :  { %381 = vrot.lane.b32.xlu1 %v323_v39, %s1173_s27  ;;  %383 = vrot.lane.b32.xlu0 %v324_v7, %s1173_s27  ;;  %v1123_v39 = vpack.i.bf16 %v1244_v13, %v1348_v58  ;;  %v2213_v7 = vmov 0  ;;  %v1540_v13 = vsel %vm2218_vm8, %v309_v11, %v311_v56  ;;  %v2220_v58 = vmov 0  ;;  %v1557_v56 = vpop.permute.xlu0 %1049 }
  0x98   :  { %v2214_v7 = vsel %vm1523_vm4, 4294967295, %v2213_v7  ;;  %2219 = vst [vmem:[#allocation14_spill] sm:$0xff] %v1540_v13  ;;  %v2221_v58 = vsel %vm1545_vm11, 4294967295, %v2220_v58  ;;  %v327_v4 = vsel %vm1545_vm11, %v1540_v13, 0.0  ;;  %vm2146_vm11 = vcmp.lt.s32.totalorder %v1274_v24, 1 }
  0x99   :  { %2215 = vst [vmem:[#allocation12_spill] sm:$0xff] %v2214_v7  ;;  %2222 = vst [vmem:[#allocation15_spill] sm:$0xff] %v2221_v58 }
  0x9b   :  { %385 = vrot.lane.b32.xlu1 %v325_v40, %s1173_s27  ;;  %377 = vrot.lane.b32.xlu0 %v321_v59, %s1173_s27  ;;  %v326_v59 = vsel %vm1523_vm4, %v1529_v32, 0.0 }
  0x9c   :  { %v1133_v29 = vpack.i.bf16 %v326_v59, %v325_v40  ;;  %v48_v40 = vand.u32 31, %v1286_v28 }
  0x9e   :  { %vm1585_vm1 = vcmp.ge.s32.totalorder %v48_v40, 1  ;;  %vm1602_vm0 = vcmp.lt.s32.totalorder %v48_v40, 31 }
  0x9f   :  { %1119 = vrot.lane.b32.xlu1 %v1113_v49, %s1173_s27  ;;  %1124 = vrot.lane.b32.xlu0 %v1123_v39, %s1173_s27  ;;  %v46_v49 = vand.u32 31, %v1277_v25 }
  0xa1   :  { %vm1568_vm8 = vcmp.ge.s32.totalorder %v46_v49, 1 }
  0xa2   :  { %vm2237_vm14 = vmpackc.low %vm1305_vm3, %vm1568_vm8 }
  0xa3   :  { %1129 = vrot.lane.b32.xlu1 %v1128_v18, %s1173_s27  ;;  %220 = vrot.lane.b32.xlu0 %v1207_v3, %s1172_s0  ;;  %v1045_v3 = vpop.permute.xlu1 %1044  ;;  %v1561_v18 = vpop.permute.xlu0 %1054  ;;  %vm2241_vm3 = vmmov %vm2240_vm9 }
  0xa4   :  { %v1046_v7 = vunpack.i.l.bf16 %v1045_v3  ;;  %v1057_v12 = vunpack.i.h.bf16 %v1561_v18  ;;  %vm2245_vm10 = vmmov %vm2241_vm3 }
  0xa7   :  { %341 = vrot.lane.b32.xlu1 %v327_v4, %s1172_s0  ;;  %1134 = vrot.lane.b32.xlu0 %v1133_v29, %s1172_s0  ;;  %v1559_v57 = vpop.permute.xlu1 %1059 }
  0xa8   :  { %v2251_v53 = vunpack.i.l.bf16 %v1559_v57  ;;  %v1062_v52 = vunpack.i.h.bf16 %v1559_v57 }
  0xab   :  { %389 = vrot.lane.b32.xlu1 %v327_v4, %s1173_s27  ;;  %387 = vrot.lane.b32.xlu0 %v326_v59, %s1173_s27  ;;  %v1566_v11 = vpop.permute.xlu1 %1064 }
  0xaf   :  { %391 = vrot.lane.b32.xlu0 %v328_v37, %s1173_s27  ;;  %v47_v37 = vand.u32 31, %v1283_v27  ;;  %v2339_v27 = vld [vmem:[#allocation11_spill] sm:$0xff] }
  0xb1   :  { %vm1594_vm4 = vcmp.ge.s32.totalorder %v47_v37, 1  ;;  %vm1609_vm7 = vcmp.lt.s32.totalorder %v47_v37, 31 }
  0xf1   :  { %v1070_v39 = vpop.permute.xlu0 %1069 }
  0xf2   :  { %v1072_v29 = vunpack.i.h.bf16 %v1070_v39  ;;  %v1071_v4 = vunpack.i.l.bf16 %v1070_v39 }
  0xf4   :  { %v141_v25 = vsel %vm2146_vm11, %v1071_v4, %v1072_v29  ;;  %vm1598_vm11 = vcmp.lt.s32.totalorder %v46_v49, 31 }
  0xf5   :  { %v1589_v39 = vpop.permute.xlu1 %1074  ;;  %v1591_v43 = vpop.permute.xlu0 %1079  ;;  %v922_v23 = vpack.c.bf16 %v1314_v45, %v141_v25  ;;  %v1047_v25 = vunpack.i.h.bf16 %v1045_v3 }
  0xf6   :  { %v2163_v32 = vunpack.i.h.bf16 %v1589_v39  ;;  %v1076_v34 = vunpack.i.l.bf16 %v1589_v39  ;;  %v2161_v55 = vunpack.i.l.bf16 %v1591_v43  ;;  %v1082_v3 = vunpack.i.h.bf16 %v1591_v43 }
  0xf7   :  { %924 = vmatprep.subr.msk.bf16.mxu0 %vm2237_vm14, %v922_v23  ;;  %vm2243_vm14 = vmmov %vm2241_vm3 }
  0xf8   :  { %v142_v42 = vsel %vm2240_vm9, %v2161_v55, %v1071_v4  ;;  %v139_v23 = vsel %vm2241_vm3, %v1076_v34, %v2163_v32  ;;  %vm2242_vm9 = vmmov %vm2241_vm3  ;;  %v229_v6 = vsel %vm2243_vm14, %v1046_v7, %v1047_v25  ;;  %v230_v41 = vsel %vm2243_vm14, %v1082_v3, %v1046_v7 }
  0xf9   :  { %v1085_v37 = vpop.permute.xlu1 %1084  ;;  %v1642_v49 = vpop.permute.xlu0 %1089  ;;  %v925_v0 = vpack.c.bf16 %v1318_v46, %v142_v42  ;;  %v946_v10 = vpack.c.bf16 %v1353_v60, %v139_v23  ;;  %v140_v4 = vsel %vm2242_vm9, %v1072_v29, %v1076_v34  ;;  %v2244_v46 = vunpack.i.l.bf16 %v1557_v56  ;;  %vm2246_vm9 = vmpackc.low %vm1301_vm2, %vm1581_vm15 }
  0xfa   :  { %v1087_v55 = vunpack.i.h.bf16 %v1085_v37  ;;  %v1086_v1 = vunpack.i.l.bf16 %v1085_v37  ;;  %v1092_v32 = vunpack.i.h.bf16 %v1642_v49  ;;  %v1091_v9 = vunpack.i.l.bf16 %v1642_v49  ;;  %vm2247_vm3 = vmpackc.low %vm1340_vm6, %vm1585_vm1 }
  0xfb   :  { %v228_v60 = vsel %vm2245_vm10, %v1047_v25, %v2244_v46  ;;  %v1056_v34 = vunpack.i.l.bf16 %v1561_v18  ;;  %927 = vmatpush1.bf16.msk.msra.mxu0 %vm2246_vm9, %v925_v0  ;;  %948 = vmatprep.subr.msk.bf16.mxu1 %vm2247_vm3, %v946_v10  ;;  %v949_v29 = vpack.c.bf16 %v1357_v61, %v140_v4  ;;  %vm929_vm10 = vmpackc.low %vm1568_vm8, %vm1598_vm11  ;;  %v1052_v42 = vunpack.i.h.bf16 %v1557_v56 }
  0xfc   :  { %v189_v18 = vsel %vm2248_vm12, %v1086_v1, %v1087_v55  ;;  %vm2249_vm2 = vmmov %vm2248_vm12 }
  0xfd   :  { %v187_v0 = vsel %vm2249_vm2, %v1091_v9, %v1092_v32  ;;  %vm2250_vm6 = vmmov %vm2249_vm2  ;;  %v928_v7 = vpack.c.bf16 %v230_v41, %v189_v18 }
  0xfe   :  { %v188_v10 = vsel %vm2250_vm6, %v1087_v55, %v1091_v9  ;;  %vm953_vm3 = vmpackc.low %vm1585_vm1, %vm1602_vm0  ;;  %v952_v25 = vpack.c.bf16 %v228_v60, %v187_v0  ;;  %v1699_v9 = vpop.permute.xlu1 %1094  ;;  %v1100_v55 = vpop.permute.xlu0 %1099 }
  0xff   :  { %vm2252_vm9 = vmmov %vm2249_vm2  ;;  %v955_v37 = vpack.c.bf16 %v229_v6, %v188_v10  ;;  %v1097_v23 = vunpack.i.h.bf16 %v1699_v9  ;;  %v1096_v4 = vunpack.i.l.bf16 %v1699_v9  ;;  %v276_v6 = vsel %vm2249_vm2, %v1056_v34, %v1057_v12  ;;  %930 = vmatprep.subr.msk.bf16.mxu0 %vm929_vm10, %v928_v7 }
 0x100   :  { %v275_v61 = vsel %vm2252_vm9, %v1057_v12, %v2251_v53  ;;  %vm2253_vm12 = vmpackc.low %vm1336_vm5, %vm1594_vm4  ;;  %v1102_v46 = vunpack.i.h.bf16 %v1100_v55  ;;  %v1101_v60 = vunpack.i.l.bf16 %v1100_v55  ;;  %vm2254_vm5 = vcmask 1045504  }
 0x101   :  { %951 = vmatpush1.bf16.msk.msra.mxu1 %vm2253_vm12, %v949_v29  ;;  %vm956_vm14 = vmpackc.low %vm1594_vm4, %vm1609_vm7  ;;  %v958_v12 = vpack.c.bf16 %v275_v61, %v1254_v15  ;;  %vm2257_vm9 = vcmp.lt.s32.totalorder %v1274_v24, 1  ;;  %v961_v7 = vpack.c.bf16 %v276_v6, %v1249_v14 }
 0x102   :  { %954 = vmatprep.subr.msk.bf16.mxu1 %vm953_vm3, %v952_v25  ;;  %vm1724_vm6 = vmpackc.low %vm1602_vm0, %vm2254_vm5  ;;  %v231_v41 = vsel %vm2257_vm9, %v1052_v42, %v1082_v3  ;;  %v1744_v53 = vpop.permute.xlu1 %1104  ;;  %v1746_v3 = vpop.permute.xlu0 %1109 }
 0x103   :  { %vm2258_vm10 = vmmov %vm2249_vm2  ;;  %v1106_v61 = vunpack.i.l.bf16 %v1744_v53 }
 0x104   :  { %v277_v18 = vsel %vm2258_vm10, %v1097_v23, %v1056_v34  ;;  %vm2259_vm3 = vmmov %vm2249_vm2  ;;  %v1107_v34 = vunpack.i.h.bf16 %v1744_v53  ;;  %v2343_v53 = vld [vmem:[#allocation13_spill] sm:$0xff] }
 0x105   :  { %v190_v0 = vsel %vm2259_vm3, %v1096_v4, %v1086_v1  ;;  %vm932_vm12 = vmpackc.low %vm1581_vm15, %vm1623_vm13  ;;  %v934_v15 = vpack.c.bf16 %v277_v18, %v1216_v5  ;;  %957 = vmatpush1.bf16.msk.msra.mxu1 %vm956_vm14, %v955_v37  ;;  %v1111_v5 = vunpack.i.l.bf16 %v1746_v3 }
 0x106   :  { %v931_v10 = vpack.c.bf16 %v231_v41, %v190_v0  ;;  %vm2260_vm2 = vmmov %vm2254_vm5  ;;  %960 = vmatprep.subr.msk.bf16.mxu1 %vm1724_vm6, %v958_v12  ;;  %v1115_v12 = vpop.permute.xlu1 %1114  ;;  %v380_v41 = vpop.permute.xlu0 %379 }
 0x107   :  { %vm935_vm5 = vmpackc.low %vm1598_vm11, %vm2260_vm2 }
 0x108   :  { %vm2261_vm9 = vmmov %vm2259_vm3  ;;  %vm2263_vm3 = vcmp.lt.s32.totalorder %v1274_v24, 1  ;;  %933 = vmatpush1.bf16.msk.msra.mxu0 %vm932_vm12, %v931_v10  ;;  %vm2268_vm12 = vnez %v2195_v51 }
 0x109   :  { %v278_v1 = vsel %vm2261_vm9, %v1062_v52, %v1097_v23  ;;  %vm2262_vm14 = vmmov %vm2260_vm2  ;;  %v351_v25 = vsel %vm2263_vm3, %v1101_v60, %v1102_v46  ;;  %936 = vmatprep.subr.msk.bf16.mxu0 %vm935_vm5, %v934_v15  ;;  %vm2271_vm5 = vnez %v2197_v44 }
 0x10a   :  { %vm962_vm10 = vmpackc.low %vm1609_vm7, %vm2262_vm14  ;;  %v937_v14 = vpack.c.bf16 %v278_v1, %v1203_v2  ;;  %v50_v2 = vand.u32 31, %v1382_v19  ;;  %v382_v19 = vpop.permute.xlu1 %381  ;;  %v384_v13 = vpop.permute.xlu0 %383  ;;  %v1851_v1 = vld [vmem:[%s2125_s1] sm:$0xff] }
 0x10b   :  { %vm1769_vm9 = vmpackc.low %vm1623_vm13, %vm2260_vm2  ;;  %963 = vmatpush1.bf16.msk.msra.mxu1 %vm962_vm10, %v961_v7  ;;  %vm2269_vm2 = vnez %v2187_v21  ;;  %v52_v21 = vand.u32 31, %v1280_v26 }
 0x10c   :  { %vm2266_vm6 = vmmov %vm2263_vm3  ;;  %939 = vmatpush1.bf16.msk.msra.mxu0 %vm1769_vm9, %v937_v14  ;;  %vm1811_vm9 = vcmp.ge.s32.totalorder %v50_v2, 1 }
 0x10d   :  { %v349_v55 = vsel %vm2266_vm6, %v1106_v61, %v1107_v34  ;;  %vm2267_vm14 = vmmov %vm2263_vm3 }
 0x10e   :  { %v350_v23 = vsel %vm2267_vm14, %v1102_v46, %v1106_v61  ;;  %vm965_vm3 = vmpackc.low %vm2268_vm12, %vm1585_vm1  ;;  %v964_v6 = vpack.c.bf16 %v1438_v16, %v349_v55  ;;  %v940_v46 = vpack.c.bf16 %v1403_v36, %v351_v25  ;;  %v1117_v36 = vunpack.i.h.bf16 %v1115_v12  ;;  %v1831_v0 = vpop.permute.xlu1 %385  ;;  %v1833_v15 = vpop.permute.xlu0 %377 }
 0x10f   :  { %v967_v29 = vpack.c.bf16 %v1434_v38, %v350_v23  ;;  %vm941_vm6 = vmpackc.low %vm2269_vm2, %vm1568_vm8  ;;  %v1116_v38 = vunpack.i.l.bf16 %v1115_v12  ;;  %vm2272_vm8 = vnez %v2190_v22  ;;  %v1112_v16 = vunpack.i.h.bf16 %v1746_v3  ;;  %v2333_v3 = vld [vmem:[#allocation12_spill] sm:$0xff]  ;;  %v2345_v22 = vld [vmem:[#allocation15_spill] sm:$0xff] }
 0x110   :  { %vm2270_vm1 = vmmov %vm2267_vm14  ;;  %966 = vmatprep.subr.msk.bf16.mxu1 %vm965_vm3, %v964_v6  ;;  %942 = vmatprep.subr.msk.bf16.mxu0 %vm941_vm6, %v940_v46  ;;  %vm1817_vm3 = vcmp.ge.s32.totalorder %v52_v21, 1  ;;  %vm2283_vm6 = vnez %v2200_v30  ;;  %v1066_v25 = vunpack.i.l.bf16 %v1566_v11  ;;  %v2292_v30 = vmov 0 }
 0x111   :  { %v352_v51 = vsel %vm2270_vm1, %v1111_v5, %v1101_v60  ;;  %vm968_vm14 = vmpackc.low %vm2271_vm5, %vm1594_vm4  ;;  %vm2273_vm4 = vcmp.lt.s32.totalorder %v1274_v24, 127  ;;  %v2281_v60 = vunpack.i.h.bf16 %v1589_v39  ;;  %vm2167_vm5 = vcmask 588800  }
 0x112   :  { %vm944_vm10 = vmpackc.low %vm2272_vm8, %vm1581_vm15  ;;  %v943_v44 = vpack.c.bf16 %v1399_v35, %v352_v51  ;;  %969 = vmatpush1.bf16.msk.msra.mxu1 %vm968_vm14, %v967_v29  ;;  %v398_v59 = vsel %vm2273_vm4, %v380_v41, %v382_v19  ;;  %v2279_v35 = vunpack.i.l.bf16 %v1591_v43  ;;  %v1120_v17 = vpop.permute.xlu1 %1119  ;;  %v1125_v40 = vpop.permute.xlu0 %1124  ;;  %v2305_v29 = vmov 0 }
 0x113   :  { %vm2276_vm12 = vmmov %vm2270_vm1  ;;  %v1122_v45 = vunpack.i.h.bf16 %v1120_v17  ;;  %v1121_v55 = vunpack.i.l.bf16 %v1120_v17  ;;  %v1127_v23 = vunpack.i.h.bf16 %v1125_v40  ;;  %v2307_v12 = vmov 0.0   ;;  %v2337_v17 = vld [vmem:[#allocation8_spill] sm:$0xff] }
 0x114   :  { %v137_v26 = vsel %vm2276_vm12, %v1112_v16, %v1116_v38  ;;  %945 = vmatpush1.bf16.msk.msra.mxu0 %vm944_vm10, %v943_v44  ;;  %vm2280_vm15 = vmmov %vm2270_vm1  ;;  %vm2287_vm10 = vnez %v2179_v47 }
 0x115   :  { %v135_v28 = vsel %vm2280_vm15, %v1117_v36, %v2279_v35  ;;  %866 = vmatprep.subr.msk.mxu0 %vm1598_vm11, %v398_v59  ;;  %vm2282_vm2 = vmmov %vm2270_vm1  ;;  %v970_v58 = vpack.c.bf16 %v1465_v50, %v137_v26  ;;  %v1067_v50 = vunpack.i.h.bf16 %v1566_v11  ;;  %vm1874_vm15 = vcmp.lt.s32.totalorder %v50_v2, 31 }
 0x116   :  { %v138_v18 = vsel %vm2282_vm2, %v2281_v60, %v1112_v16  ;;  %vm971_vm1 = vmpackc.low %vm2283_vm6, %vm1811_vm9  ;;  %v994_v61 = vpack.c.bf16 %v1328_v48, %v135_v28  ;;  %v2312_v2 = vunpack.i.l.bf16 %v1559_v57  ;;  %v1130_v16 = vpop.permute.xlu1 %1129  ;;  %v221_v44 = vpop.permute.xlu0 %220  ;;  %v2325_v57 = vld [vmem:[#allocation5_spill] sm:$0xff] }
 0x117   :  { %vm2284_vm14 = vmmov %vm2282_vm2  ;;  %v973_v37 = vpack.c.bf16 %v1367_v63, %v138_v18  ;;  %v2291_v63 = vand.u32 31, %v1291_v31  ;;  %vm2297_vm2 = vnez %v2204_v54  ;;  %v1901_v31 = vld [vmem:[%s2125_s1 + $0x8] sm:$0xff]  ;;  %v2347_v54 = vld [vmem:[#allocation14_spill] sm:$0xff] }
 0x118   :  { %v136_v43 = vsel %vm2284_vm14, %v1116_v38, %v1117_v36  ;;  %vm2285_vm11 = vmmov %vm2273_vm4  ;;  %v2326_v18 = vld [vmem:[#allocation4_spill] sm:$0xff] }
 0x119   :  { %v396_v39 = vsel %vm2285_vm11, %v384_v13, %v1831_v0  ;;  %vm2286_vm8 = vmmov %vm2273_vm4  ;;  %v997_v48 = vpack.c.bf16 %v1461_v8, %v136_v43  ;;  %v1126_v8 = vunpack.i.l.bf16 %v1125_v40  ;;  %vm2301_vm11 = vnez %v2206_v33  ;;  %v2327_v43 = vld [vmem:[#allocation6_spill] sm:$0xff]  ;;  %v2341_v40 = vld [vmem:[#allocation9_spill] sm:$0xff] }
 0x11a   :  { %v399_v10 = vsel %vm2286_vm8, %v1833_v15, %v380_v41  ;;  %vm995_vm4 = vmpackc.low %vm2287_vm10, %vm1817_vm3  ;;  %884 = vmatprep.subr.msk.mxu1 %vm1602_vm0, %v396_v39  ;;  %vm1883_vm0 = vcmp.lt.s32.totalorder %v2291_v63, 31  ;;  %v2308_v41 = vunpack.i.l.bf16 %v1557_v56  ;;  %v342_v39 = vpop.permute.xlu1 %341 }
 0x11b   :  { %vm2288_vm12 = vmmov %vm2286_vm8  ;;  %867 = vmatpush1.msk.msra.mxu0 %vm1623_vm13, %v399_v10  ;;  %v2293_v30 = vsel %vm1883_vm0, 4294967295, %v2292_v30  ;;  %vm2296_vm13 = vnez %v2185_v62  ;;  %v2303_v62 = vld [vmem:[#allocation7_spill] sm:$0xff]  ;;  %v1135_v10 = vpop.permute.xlu0 %1134 }
 0x11c   :  { %v397_v7 = vsel %vm2288_vm12, %v382_v19, %v384_v13  ;;  %972 = vmatprep.subr.msk.bf16.mxu0 %vm971_vm1, %v970_v58  ;;  %842 = vmatmul.mubr.msk.f32.vlgmr.msra.gmra.mrb[0].mxu0 %vm2167_vm5, %v1851_v1  ;;  %vm2298_vm6 = vmpackc.low %vm2296_vm13, %vm2297_vm2  ;;  %v2304_v6 = vand.u32 31, %v2303_v62  ;;  %vm2310_vm13 = vcmp.lt.s32.totalorder %v1274_v24, 127  ;;  %v1132_v19 = vunpack.i.h.bf16 %v1130_v16 }
 0x11d   :  { %885 = vmatpush1.msk.msra.mxu1 %vm1609_vm7, %v397_v7  ;;  %vm1887_vm7 = vcmp.lt.s32.totalorder %v52_v21, 31  ;;  %975 = vmatpush1.bf16.msk.msra.mxu0 %vm2298_vm6, %v973_v37  ;;  %vm2299_vm1 = vmmov %vm2284_vm14  ;;  %vm2300_vm14 = vnez %v2202_v20  ;;  %v185_v46 = vsel %vm2310_vm13, %v1121_v55, %v1122_v45  ;;  %v1131_v13 = vunpack.i.l.bf16 %v1130_v16 }
 0x11e   :  { %996 = vmatprep.subr.msk.bf16.mxu1 %vm995_vm4, %v994_v61  ;;  %844 = vmatmul.mubr.msk.f32.vlgmr.msra.gmra.mrb[0].mxu1 %vm2167_vm5, %v1851_v1  ;;  %v226_v14 = vsel %vm2299_vm1, %v1066_v25, %v1067_v50  ;;  %vm2302_vm8 = vmpackc.low %vm2300_vm14, %vm2301_vm11  ;;  %vm1916_vm4 = vcmp.lt.s32.totalorder %v2304_v6, 31  ;;  %v1136_v37 = vunpack.i.l.bf16 %v1135_v10 }
 0x11f   :  { %999 = vmatpush1.bf16.msk.msra.mxu1 %vm2302_vm8, %v997_v48  ;;  %vm977_vm10 = vmpackc.low %vm1811_vm9, %vm1874_vm15  ;;  %v2306_v29 = vsel %vm1916_vm4, 4294967295, %v2305_v29  ;;  %568 = vmatprep.mubr.f32.mxu0 %v2307_v12  ;;  %v976_v21 = vpack.c.bf16 %v226_v14, %v185_v46  ;;  %v388_v14 = vpop.permute.xlu0 %387 }
 0x120   :  { %vm2309_vm12 = vmmov %vm2299_vm1  ;;  %645 = vmatprep.mubr.f32.mxu1 %v2307_v12  ;;  %843 = vmatmul.mubr.msk.f32.gmra.mrb[2].mxu0 %vm2167_vm5, %v1901_v31 }
 0x121   :  { %v227_v20 = vsel %vm2309_vm12, %v2308_v41, %v1066_v25  ;;  %vm2311_vm6 = vmmov %vm2310_vm13  ;;  %716 = vmatprep.mubr.f32.mxu0 %v2307_v12  ;;  %978 = vmatprep.subr.msk.bf16.mxu0 %vm977_vm10, %v976_v21  ;;  %v1137_v25 = vunpack.i.h.bf16 %v1135_v10 }
 0x122   :  { %v186_v51 = vsel %vm2311_vm6, %v1092_v32, %v1121_v55  ;;  %vm2313_vm1 = vmmov %vm2311_vm6  ;;  %vm2316_vm6 = vcmp.lt.s32.totalorder %v1274_v24, 1  ;;  %845 = vmatmul.mubr.msk.f32.gmra.mrb[2].mxu1 %vm2167_vm5, %v1901_v31 }
 0x123   :  { %v274_v38 = vsel %vm2313_vm1, %v2312_v2, %v1127_v23  ;;  %vm980_vm14 = vmpackc.low %vm2297_vm2, %vm1883_vm0  ;;  %v979_v36 = vpack.c.bf16 %v227_v20, %v186_v51  ;;  %v224_v59 = vsel %vm2316_vm6, %v221_v44, %v1052_v42  ;;  %793 = vmatprep.mubr.f32.mxu1 %v2307_v12  ;;  %v392_v41 = vpop.permute.xlu0 %391 }
 0x124   :  { %vm2314_vm8 = vmmov %vm2313_vm1  ;;  %v985_v60 = vpack.c.bf16 %v274_v38, %v2325_v57 }
 0x125   :  { %v184_v49 = vsel %vm2314_vm8, %v1122_v45, %v1126_v8  ;;  %vm2315_vm12 = vmmov %vm2313_vm1  ;;  %981 = vmatpush1.bf16.msk.msra.mxu0 %vm980_vm14, %v979_v36 }
 0x126   :  { %v191_v32 = vsel %vm2315_vm12, %v1126_v8, %v1096_v4  ;;  %vm1001_vm13 = vmpackc.low %vm1817_vm3, %vm1887_vm7  ;;  %vm2318_vm12 = vcmask 1045504   ;;  %v390_v8 = vpop.permute.xlu1 %389 }
 0x127   :  { %vm2317_vm1 = vmmov %vm2316_vm6  ;;  %v1000_v4 = vpack.c.bf16 %v224_v59, %v191_v32 }
 0x128   :  { %v225_v9 = vsel %vm2317_vm1, %v1067_v50, %v221_v44  ;;  %vm1973_vm6 = vmpackc.low %vm1874_vm15, %vm2318_vm12  ;;  %v2329_v50 = vld [vmem:[#allocation3_spill] sm:$0xff] }
 0x129   :  { %v1003_v26 = vpack.c.bf16 %v225_v9, %v184_v49  ;;  %vm2321_vm1 = vmmov %vm2314_vm8  ;;  %1002 = vmatprep.subr.msk.bf16.mxu1 %vm1001_vm13, %v1000_v4 }
 0x12a   :  { %v279_v42 = vsel %vm2321_vm1, %v1132_v19, %v1062_v52  ;;  %vm2322_vm5 = vmmov %vm2321_vm1 }
 0x12b   :  { %v272_v35 = vsel %vm2322_vm5, %v1131_v13, %v1132_v19  ;;  %vm2323_vm8 = vmmov %vm2321_vm1  ;;  %v1006_v52 = vpack.c.bf16 %v279_v42, %v2326_v18 }
 0x12c   :  { %v273_v28 = vsel %vm2323_vm8, %v1127_v23, %v1131_v13  ;;  %vm2324_vm10 = vmmov %vm2318_vm12  ;;  %v1009_v61 = vpack.c.bf16 %v272_v35, %v2329_v50  ;;  %vm2330_vm8 = vcmp.lt.s32.totalorder %v1274_v24, 1  ;;  %v2344_v23 = vld [vmem:[#allocation10_spill] sm:$0xff] }
 0x12d   :  { %vm1007_vm12 = vmpackc.low %vm1887_vm7, %vm2324_vm10  ;;  %v982_v58 = vpack.c.bf16 %v273_v28, %v2327_v43  ;;  %v345_v7 = vsel %vm2330_vm8, %v342_v39, %v1111_v5 }
 0x12e   :  { %vm2328_vm5 = vmmov %vm2324_vm10  ;;  %v1012_v63 = vpack.c.bf16 %v2341_v40, %v345_v7 }
 0x12f   :  { %vm986_vm14 = vmpackc.low %vm1883_vm0, %vm2328_vm5  ;;  %984 = vmatprep.subr.msk.bf16.mxu0 %vm1973_vm6, %v982_v58  ;;  %vm2335_vm0 = vcmp.lt.s32.totalorder %v1274_v24, 1 }
 0x130   :  { %vm2331_vm1 = vmpackc.low %vm2301_vm11, %vm1916_vm4  ;;  %v347_v5 = vsel %vm2335_vm0, %v1136_v37, %v1137_v25  ;;  %987 = vmatpush1.bf16.msk.msra.mxu0 %vm986_vm14, %v985_v60 }
 0x131   :  { %1005 = vmatpush1.bf16.msk.msra.mxu1 %vm2331_vm1, %v1003_v26  ;;  %vm2332_vm13 = vmmov %vm2328_vm5  ;;  %vm2334_vm5 = vnez %v2333_v3  ;;  %v988_v55 = vpack.c.bf16 %v2343_v53, %v347_v5 }
 0x132   :  { %vm1010_vm10 = vmpackc.low %vm1916_vm4, %vm2332_vm13  ;;  %1008 = vmatprep.subr.msk.bf16.mxu1 %vm1007_vm12, %v1006_v52  ;;  %vm2338_vm13 = vnez %v2337_v17  ;;  %vm2340_vm12 = vnez %v2339_v27 }
 0x133   :  { %vm989_vm8 = vmpackc.low %vm2334_vm5, %vm1811_vm9  ;;  %vm2354_vm5 = vnez %v2306_v29 }
 0x134   :  { %vm2336_vm1 = vmmov %vm2335_vm0  ;;  %990 = vmatprep.subr.msk.bf16.mxu0 %vm989_vm8, %v988_v55 }
 0x135   :  { %v348_v48 = vsel %vm2336_vm1, %v1107_v34, %v1136_v37  ;;  %vm1013_vm6 = vmpackc.low %vm2338_vm13, %vm1817_vm3  ;;  %1011 = vmatpush1.bf16.msk.msra.mxu1 %vm1010_vm10, %v1009_v61  ;;  %vm2346_vm3 = vnez %v2345_v22  ;;  %vm2351_vm10 = vnez %v2293_v30 }
 0x136   :  { %vm992_vm4 = vmpackc.low %vm2340_vm12, %vm2297_vm2  ;;  %v991_v34 = vpack.c.bf16 %v2344_v23, %v348_v48  ;;  %1014 = vmatprep.subr.msk.bf16.mxu1 %vm1013_vm6, %v1012_v63  ;;  %vm2348_vm2 = vcmp.lt.s32.totalorder %v1274_v24, 127 }
 0x137   :  { %vm2342_vm9 = vmmov %vm2335_vm0  ;;  %v394_v6 = vsel %vm2348_vm2, %v388_v14, %v390_v8 }
 0x138   :  { %v346_v45 = vsel %vm2342_vm9, %v1137_v25, %v342_v39  ;;  %vm1016_vm0 = vmpackc.low %vm2346_vm3, %vm2301_vm11  ;;  %993 = vmatpush1.bf16.msk.msra.mxu0 %vm992_vm4, %v991_v34 }
 0x139   :  { %v1015_v62 = vpack.c.bf16 %v2347_v54, %v346_v45  ;;  %902 = vmatprep.subr.msk.mxu0 %vm1874_vm15, %v394_v6  ;;  %vm2349_vm14 = vmmov %vm2348_vm2  ;;  %vm2353_vm15 = vcmask 588800  }
 0x13a   :  { %v400_v20 = vsel %vm2349_vm14, %v392_v41, %v1833_v15  ;;  %vm2350_vm11 = vmmov %vm2348_vm2 }
 0x13b   :  { %1017 = vmatpush1.bf16.msk.msra.mxu1 %vm1016_vm0, %v1015_v62  ;;  %v395_v33 = vsel %vm2350_vm11, %v1831_v0, %v388_v14  ;;  %vm2352_vm4 = vmmov %vm2348_vm2 }
 0x13c   :  { %920 = vmatprep.subr.msk.mxu1 %vm1887_vm7, %v400_v20  ;;  %903 = vmatpush1.msk.msra.mxu0 %vm2351_vm10, %v395_v33  ;;  %v393_v46 = vsel %vm2352_vm4, %v390_v8, %v392_v41  ;;  %vm2355_vm8 = vmmov %vm2353_vm15 }
 0x13d   :  { %846 = vmatmul.mubr.msk.f32.vlgmr.msra.gmra.mrb[4].mxu0 %vm2353_vm15, %v1851_v1  ;;  %vm2356_vm7 = vmmov %vm2355_vm8 }
 0x13e   :  { %722 = vmatprep.mubr.f32.mxu0 %v2307_v12  ;;  %vm2357_vm1 = vmmov %vm2356_vm7 }
 0x13f   :  { %921 = vmatpush1.msk.msra.mxu1 %vm2354_vm5, %v393_v46 }
 0x140   :  { %848 = vmatmul.mubr.msk.f32.vlgmr.msra.gmra.mrb[4].mxu1 %vm2355_vm8, %v1851_v1 }
 0x141   :  { %799 = vmatprep.mubr.f32.mxu1 %v2307_v12  ;;  %847 = vmatmul.mubr.msk.f32.gmra.mrb[6].mxu0 %vm2356_vm7, %v1901_v31 }
 0x144   :  { %849 = vmatmul.mubr.msk.f32.gmra.mrb[6].mxu1 %vm2357_vm1, %v1901_v31 }
 0x1ef   :  { %v564_v24 = vpop.f32.mrb[0].mxu0 }
 0x1f0   :  { %1138 = vtanh.f32 %v564_v24  ;;  %v566_v15 = vpop.f32.mrb[1].mxu0 }
 0x1f1   :  { %v641_v0 = vpop.f32.mrb[0].mxu1 }
 0x1f2   :  { %1140 = vtanh.f32 %v641_v0  ;;  %v643_v47 = vpop.f32.mrb[1].mxu1 }
 0x1f3   :  { %1142 = vtanh.f32 %v566_v15  ;;  %v570_v30 = vpop.f32.mrb[2].mxu0 }
 0x1f4   :  { %1144 = vtanh.f32 %v643_v47  ;;  %v572_v1 = vpop.f32.mrb[3].mxu0 }
 0x1f5   :  { %1146 = vtanh.f32 %v570_v30  ;;  %v647_v11 = vpop.f32.mrb[2].mxu1 }
 0x1f6   :  { %1148 = vtanh.f32 %v647_v11  ;;  %v649_v29 = vpop.f32.mrb[3].mxu1 }
 0x1f7   :  { %1150 = vtanh.f32 %v572_v1 }
 0x1f8   :  { %1152 = vtanh.f32 %v649_v29 }
 0x1fa   :  { %v1139_v12 = vpop.eup %1138 }
 0x1fb   :  { %822 = vst [vmem:[%s2126_s2] sm:$0xff] %v1139_v12 }
 0x1fc   :  { %v1141_v51 = vpop.eup %1140 }
 0x1fd   :  { %v1143_v31 = vpop.eup %1142  ;;  %824 = vst [vmem:[%s2126_s2 + $0x10] sm:$0xff] %v1141_v51 }
 0x1fe   :  { %v1145_v2 = vpop.eup %1144  ;;  %823 = vst [vmem:[%s2126_s2 + $0x8] sm:$0xff] %v1143_v31 }
 0x1ff   :  { %v1147_v38 = vpop.eup %1146  ;;  %825 = vst [vmem:[%s2126_s2 + $0x18] sm:$0xff] %v1145_v2 }
 0x200   :  { %v1149_v21 = vpop.eup %1148  ;;  %830 = vst [vmem:[%s2126_s2 + $0x40] sm:$0xff] %v1147_v38 }
 0x201   :  { %v1151_v36 = vpop.eup %1150  ;;  %832 = vst [vmem:[%s2126_s2 + $0x50] sm:$0xff] %v1149_v21 }
 0x202   :  { %v1153_v16 = vpop.eup %1152  ;;  %831 = vst [vmem:[%s2126_s2 + $0x48] sm:$0xff] %v1151_v36 }
 0x203   :  { %833 = vst [vmem:[%s2126_s2 + $0x58] sm:$0xff] %v1153_v16 }
 0x210   :  { %v718_v44 = vpop.f32.mrb[4].mxu0 }
 0x211   :  { %1154 = vtanh.f32 %v718_v44  ;;  %v720_v49 = vpop.f32.mrb[5].mxu0 }
 0x212   :  { %1156 = vtanh.f32 %v720_v49 }
 0x213   :  { %v795_v32 = vpop.f32.mrb[4].mxu1 }
 0x214   :  { %1158 = vtanh.f32 %v795_v32  ;;  %v797_v19 = vpop.f32.mrb[5].mxu1  ;;  %v724_v13 = vpop.f32.mrb[6].mxu0 }
 0x215   :  { %1160 = vtanh.f32 %v797_v19  ;;  %v726_v59 = vpop.f32.mrb[7].mxu0 }
 0x216   :  { %1162 = vtanh.f32 %v724_v13 }
 0x217   :  { %1164 = vtanh.f32 %v726_v59  ;;  %v801_v9 = vpop.f32.mrb[6].mxu1 }
 0x218   :  { %1166 = vtanh.f32 %v801_v9  ;;  %v803_v4 = vpop.f32.mrb[7].mxu1 }
 0x219   :  { %1168 = vtanh.f32 %v803_v4 }
 0x21b   :  { %v1155_v26 = vpop.eup %1154 }
 0x21c   :  { %v1157_v56 = vpop.eup %1156  ;;  %826 = vst [vmem:[%s2126_s2 + $0x20] sm:$0xff] %v1155_v26 }
 0x21d   :  { %827 = vst [vmem:[%s2126_s2 + $0x28] sm:$0xff] %v1157_v56 }
 0x21e   :  { %v1159_v42 = vpop.eup %1158 }
 0x21f   :  { %v1161_v35 = vpop.eup %1160  ;;  %828 = vst [vmem:[%s2126_s2 + $0x30] sm:$0xff] %v1159_v42 }
 0x220   :  { %v1163_v28 = vpop.eup %1162  ;;  %829 = vst [vmem:[%s2126_s2 + $0x38] sm:$0xff] %v1161_v35 }
 0x221   :  { %v1165_v57 = vpop.eup %1164  ;;  %834 = vst [vmem:[%s2126_s2 + $0x60] sm:$0xff] %v1163_v28 }
 0x222   :  { %v1167_v60 = vpop.eup %1166  ;;  %835 = vst [vmem:[%s2126_s2 + $0x68] sm:$0xff] %v1165_v57 }
 0x223   :  { %v1169_v18 = vpop.eup %1168  ;;  %836 = vst [vmem:[%s2126_s2 + $0x70] sm:$0xff] %v1167_v60 }
 0x224   :  { %837 = vst [vmem:[%s2126_s2 + $0x78] sm:$0xff] %v1169_v18 }

</bundles_post_ra>
